<compile_context>
chip_gen: v5e
topology: v5e:2x2
jax: 0.10.0
libtpu: 0.0.40
codegen_flags: <defaults>
</compile_context>

<pallas_src>
import functools
import math

import jax
import jax.numpy as jnp
from jax.experimental import pallas as pl
from jax.experimental.pallas import tpu as pltpu

EPS = 1e-32
MAX_ROW_LOSS = -math.log(EPS)        # torch.clamp(p, eps).log() floor (~73.68)
NEG_BIG = -1e30                      # finite "-inf" for masking ragged vocab lanes

LANE = 128
SUBLANE = 8
MAX_TILE_V = 4096                    # lanes per vocab tile cap (multiple of 128)
TARGET_TILE_BYTES = 12 * 1024 * 1024 # per logits buffer (double-buffered by pipeline)


def _round_up(x, m):
    return (x + m - 1) // m * m


def _cdiv(a, b):
    return -(-a // b)


def _nested_ce_kernel(x_ref, xl_ref, out_ref, m_sc, l_sc, *,
                      actual_v, tile_v, mask_cols):
    # x_ref:   (TILE_N, TILE_V) logits tile (native dtype, cast in-register)
    # xl_ref:  (TILE_N, 1)      f32 label logit x[row, y[row]] (wrapper gather)
    # out_ref: (TILE_N, 1)      f32 per-row losses (written at last vocab tile)
    # scratch: running max m, rescaled exp-sum l
    k = pl.program_id(1)

    @pl.when(k == 0)
    def _init():
        m_sc[...] = jnp.full_like(m_sc, NEG_BIG)
        l_sc[...] = jnp.zeros_like(l_sc)

    # Cast in-register; HBM traffic stays at the model dtype (e.g. bf16).
    x = x_ref[...].astype(jnp.float32)                       # (TILE_N, TILE_V)

    if mask_cols:                                            # static: ragged vocab only
        # Valid lane count in this tile (== tile_v except the last vocab tile).
        limit = jnp.minimum(actual_v - k * tile_v, tile_v)
        col = jax.lax.broadcasted_iota(jnp.int32, x.shape, 1)
        x = jnp.where(col < limit, x, NEG_BIG)

    # Online (streaming) logsumexp update.
    m_prev = m_sc[...]
    m_new = jnp.maximum(m_prev, jnp.max(x, axis=-1, keepdims=True))
    l_sc[...] = jnp.exp(m_prev - m_new) * l_sc[...] + jnp.sum(
        jnp.exp(x - m_new), axis=-1, keepdims=True)
    m_sc[...] = m_new

    @pl.when(k == pl.num_programs(1) - 1)
    def _finalize():
        lse = m_sc[...] + jnp.log(l_sc[...])
        out_ref[...] = jnp.minimum(lse - xl_ref[...], MAX_ROW_LOSS)  # clamp(p, eps)


def nested_cross_entropy_loss(x, y):
    """x: float logits [..., V]; y: int labels [...]. Returns scalar f32 loss."""
    # TODO(synk): `groups` branch (sumup_by_index over python index lists +
    # per-group weighted CE) and by_index=False (soft-label y) not implemented;
    # default (groups=None, by_index=True, reduction='sum') hot path only.
    V = x.shape[-1]
    x2 = x.reshape(-1, V)
    y2 = y.reshape(-1).astype(jnp.int32)
    N = x2.shape[0]
    itemsize = jnp.dtype(x2.dtype).itemsize

    # ---- vocab tiling -------------------------------------------------------
    if V <= MAX_TILE_V:
        tile_v = V                                  # single full-extent vocab tile
    else:
        n_vt = _cdiv(V, MAX_TILE_V)
        tile_v = _round_up(_cdiv(V, n_vt), LANE)    # minimize ragged waste
    num_v_tiles = _cdiv(V, tile_v)
    mask_cols = (V % tile_v) != 0                   # only the last vocab tile is ragged

    # ---- row tiling ---------------------------------------------------------
    max_rows = max(SUBLANE,
                   (TARGET_TILE_BYTES // (tile_v * itemsize)) // SUBLANE * SUBLANE)
    tile_n = min(1024, max_rows, _round_up(N, SUBLANE))
    # >= 2 row tiles when possible so both TensorCores get work (megacore).
    tile_n = min(tile_n, _round_up(_cdiv(N, 2), SUBLANE))
    tile_n = max(SUBLANE, int(tile_n))
    num_n_tiles = _cdiv(N, tile_n)

    # ---- tiny wrapper-side label-logit gather (N elements, negligible HBM) --
    y_safe = jnp.clip(y2, 0, V - 1)
    x_label = jnp.take_along_axis(x2, y_safe[:, None], axis=1).astype(jnp.float32)

    kernel = functools.partial(_nested_ce_kernel, actual_v=V, tile_v=tile_v,
                               mask_cols=mask_cols)

    row_losses = pl.pallas_call(
        kernel,
        out_shape=jax.ShapeDtypeStruct((N, 1), jnp.float32),
        grid_spec=pltpu.PrefetchScalarGridSpec(
            num_scalar_prefetch=0,
            grid=(num_n_tiles, num_v_tiles),
            in_specs=[
                pl.BlockSpec((tile_n, tile_v), lambda i, k: (i, k)),
                pl.BlockSpec((tile_n, 1), lambda i, k: (i, 0)),
            ],
            out_specs=pl.BlockSpec((tile_n, 1), lambda i, k: (i, 0)),
            scratch_shapes=[pltpu.VMEM((tile_n, 1), jnp.float32)] * 2,
        ),
        compiler_params=pltpu.CompilerParams(
            dimension_semantics=("parallel", "arbitrary"),
            vmem_limit_bytes=48 * 1024 * 1024,   # fits v7x's 64 MiB VMEM with headroom
        ),
    )(x2, x_label)

    # Out-of-range labels contribute 0 (one_hot would give an all-zero row).
    valid = jnp.logical_and(y2 >= 0, y2 < V)
    return jnp.sum(jnp.where(valid, row_losses[:, 0], 0.0))


def _reference(x, y):
    V = x.shape[-1]
    x2 = x.reshape(-1, V).astype(jnp.float32)
    y2 = y.reshape(-1)
    p = jax.nn.softmax(x2, axis=-1)
    logp = jnp.log(jnp.maximum(p, EPS))
    onehot = jax.nn.one_hot(y2, V, dtype=jnp.float32)
    return -jnp.sum(onehot * logp)


if __name__ == "__main__":
    key = jax.random.PRNGKey(0)

    # Case 1: small shape from the module spec (batch=2, seq=8, classes=32).
    k1, k2, key = jax.random.split(key, 3)
    x1 = jax.random.normal(k1, (2, 8, 32), dtype=jnp.float32)
    y1 = jax.random.randint(k2, (2, 8), 0, 32, dtype=jnp.int32)

    # Case 2: ragged row tiles + non-128 vocab + bf16 logits.
    k3, k4, key = jax.random.split(key, 3)
    x2 = jax.random.normal(k3, (600, 193), dtype=jnp.bfloat16)
    y2 = jax.random.randint(k4, (600,), 0, 193, dtype=jnp.int32)

    # Case 3: vocab-tiled online-logsumexp path (V > 4096) with ragged vocab tile.
    k5, k6, key = jax.random.split(key, 3)
    x3 = jax.random.normal(k5, (64, 5000), dtype=jnp.float32)
    y3 = jax.random.randint(k6, (64,), 0, 5000, dtype=jnp.int32)

    # Case 4: ragged rows (N=111, not a multiple of 8) + ragged vocab + bf16.
    k7, k8, key = jax.random.split(key, 3)
    x4 = jax.random.normal(k7, (3, 37, 4500), dtype=jnp.bfloat16)
    y4 = jax.random.randint(k8, (3, 37), 0, 4500, dtype=jnp.int32)

    for xi, yi in ((x1, y1), (x2, y2), (x3, y3), (x4, y4)):
        loss = jax.block_until_ready(nested_cross_entropy_loss(xi, yi))
        ref = _reference(xi, yi)
        assert jnp.allclose(loss, ref, rtol=1e-3, atol=1e-2), (xi.shape, loss, ref)

    print("KERNEL_OK")
</pallas_src>

<mosaic_0001>
module attributes {stable_mosaic.version = 11 : i64} {
  func.func @_nested_ce_kernel(%arg0: i32, %arg1: i32, %arg2: memref<8x32xf32, #tpu.memory_space<vmem>>, %arg3: memref<8x1xf32, #tpu.memory_space<vmem>>, %arg4: memref<8x1xf32, #tpu.memory_space<vmem>>, %arg5: memref<8x1xf32, #tpu.memory_space<vmem>>, %arg6: memref<8x1xf32, #tpu.memory_space<vmem>>) attributes {dimension_semantics = [#tpu.dimension_semantics<parallel>, #tpu.dimension_semantics<arbitrary>], iteration_bounds = array<i64: 2, 1>, scalar_prefetch = 0 : i64, scratch_operands = 2 : i64, tpu.core_type = #tpu.core_type<tc>, window_params = [{transform_indices = @transform_0, window_bounds = array<i64: 8, 32>}, {transform_indices = @transform_1, window_bounds = array<i64: 8, 1>}, {transform_indices = @transform_2, window_bounds = array<i64: 8, 1>}]} {
    %c0_i32 = arith.constant 0 : i32
    %0 = arith.cmpi eq, %arg1, %c0_i32 : i32
    %1 = arith.extui %0 : i1 to i32
    %c0_i32_0 = arith.constant 0 : i32
    %2 = arith.cmpi ne, %1, %c0_i32_0 : i32
    scf.if %2 {
      %cst_13 = arith.constant -1.000000e+30 : f32
      %23 = vector.broadcast %cst_13 : f32 to vector<8x1xf32>
      %c0_14 = arith.constant 0 : index
      %c0_15 = arith.constant 0 : index
      %24 = vector.load %arg5[%c0_14, %c0_15] : memref<8x1xf32, #tpu.memory_space<vmem>>, vector<8x1xf32>
      tpu.vector_store %arg5[%c0_14, %c0_15], %23 {strides = array<i32>} : memref<8x1xf32, #tpu.memory_space<vmem>>, vector<8x1xf32>,
      %cst_16 = arith.constant 0.000000e+00 : f32
      %25 = vector.broadcast %cst_16 : f32 to vector<8x1xf32>
      %c0_17 = arith.constant 0 : index
      %c0_18 = arith.constant 0 : index
      %26 = vector.load %arg6[%c0_17, %c0_18] : memref<8x1xf32, #tpu.memory_space<vmem>>, vector<8x1xf32>
      tpu.vector_store %arg6[%c0_17, %c0_18], %25 {strides = array<i32>} : memref<8x1xf32, #tpu.memory_space<vmem>>, vector<8x1xf32>,
    } else {
    }
    %c0 = arith.constant 0 : index
    %c0_1 = arith.constant 0 : index
    %3 = vector.load %arg2[%c0, %c0_1] : memref<8x32xf32, #tpu.memory_space<vmem>>, vector<8x32xf32>
    %c0_2 = arith.constant 0 : index
    %c0_3 = arith.constant 0 : index
    %4 = vector.load %arg5[%c0_2, %c0_3] : memref<8x1xf32, #tpu.memory_space<vmem>>, vector<8x1xf32>
    %cst = arith.constant dense<0xFF800000> : vector<8xf32>
    %5 = vector.multi_reduction <maximumf>, %3, %cst [1] : vector<8x32xf32> to vector<8xf32>
    %6 = vector.shape_cast %5 : vector<8xf32> to vector<8x1xf32>
    %7 = arith.maximumf %4, %6 : vector<8x1xf32>
    %8 = arith.subf %4, %7 : vector<8x1xf32>
    %9 = math.exp %8 : vector<8x1xf32>
    %c0_4 = arith.constant 0 : index
    %c0_5 = arith.constant 0 : index
    %10 = vector.load %arg6[%c0_4, %c0_5] : memref<8x1xf32, #tpu.memory_space<vmem>>, vector<8x1xf32>
    %11 = arith.mulf %9, %10 : vector<8x1xf32>
    %12 = vector.broadcast %7 : vector<8x1xf32> to vector<8x32xf32>
    %13 = arith.subf %3, %12 : vector<8x32xf32>
    %14 = math.exp %13 : vector<8x32xf32>
    %cst_6 = arith.constant dense<0.000000e+00> : vector<8xf32>
    %15 = vector.multi_reduction <add>, %14, %cst_6 [1] : vector<8x32xf32> to vector<8xf32>
    %16 = vector.shape_cast %15 : vector<8xf32> to vector<8x1xf32>
    %17 = arith.addf %11, %16 : vector<8x1xf32>
    %c0_7 = arith.constant 0 : index
    %c0_8 = arith.constant 0 : index
    %18 = vector.load %arg6[%c0_7, %c0_8] : memref<8x1xf32, #tpu.memory_space<vmem>>, vector<8x1xf32>
    tpu.vector_store %arg6[%c0_7, %c0_8], %17 {strides = array<i32>} : memref<8x1xf32, #tpu.memory_space<vmem>>, vector<8x1xf32>,
    %c0_9 = arith.constant 0 : index
    %c0_10 = arith.constant 0 : index
    %19 = vector.load %arg5[%c0_9, %c0_10] : memref<8x1xf32, #tpu.memory_space<vmem>>, vector<8x1xf32>
    tpu.vector_store %arg5[%c0_9, %c0_10], %7 {strides = array<i32>} : memref<8x1xf32, #tpu.memory_space<vmem>>, vector<8x1xf32>,
    %c0_i32_11 = arith.constant 0 : i32
    %20 = arith.cmpi eq, %arg1, %c0_i32_11 : i32
    %21 = arith.extui %20 : i1 to i32
    %c0_i32_12 = arith.constant 0 : i32
    %22 = arith.cmpi ne, %21, %c0_i32_12 : i32
    scf.if %22 {
      %c0_13 = arith.constant 0 : index
      %c0_14 = arith.constant 0 : index
      %23 = vector.load %arg5[%c0_13, %c0_14] : memref<8x1xf32, #tpu.memory_space<vmem>>, vector<8x1xf32>
      %c0_15 = arith.constant 0 : index
      %c0_16 = arith.constant 0 : index
      %24 = vector.load %arg6[%c0_15, %c0_16] : memref<8x1xf32, #tpu.memory_space<vmem>>, vector<8x1xf32>
      %25 = math.log %24 : vector<8x1xf32>
      %26 = arith.addf %23, %25 : vector<8x1xf32>
      %c0_17 = arith.constant 0 : index
      %c0_18 = arith.constant 0 : index
      %27 = vector.load %arg3[%c0_17, %c0_18] : memref<8x1xf32, #tpu.memory_space<vmem>>, vector<8x1xf32>
      %28 = arith.subf %26, %27 : vector<8x1xf32>
      %cst_19 = arith.constant 73.6827239 : f32
      %29 = vector.broadcast %cst_19 : f32 to vector<8x1xf32>
      %30 = arith.minimumf %28, %29 : vector<8x1xf32>
      %c0_20 = arith.constant 0 : index
      %c0_21 = arith.constant 0 : index
      %31 = vector.load %arg4[%c0_20, %c0_21] : memref<8x1xf32, #tpu.memory_space<vmem>>, vector<8x1xf32>
      tpu.vector_store %arg4[%c0_20, %c0_21], %30 {strides = array<i32>} : memref<8x1xf32, #tpu.memory_space<vmem>>, vector<8x1xf32>,
    } else {
    }
    return
  }
  func.func @transform_0(%arg0: i32, %arg1: i32) -> (i32, i32) {
    %c0_i32 = arith.constant 0 : i32
    return %arg0, %arg1 : i32, i32
  }
  func.func @transform_1(%arg0: i32, %arg1: i32) -> (i32, i32) {
    %c0_i32 = arith.constant 0 : i32
    %c0_i32_0 = arith.constant 0 : i32
    return %arg0, %c0_i32 : i32, i32
  }
  func.func @transform_2(%arg0: i32, %arg1: i32) -> (i32, i32) {
    %c0_i32 = arith.constant 0 : i32
    %c0_i32_0 = arith.constant 0 : i32
    return %arg0, %c0_i32 : i32, i32
  }
}

</mosaic_0001>

<bundles_post_ra>
// kernel: tpu_custom_call.1
= control target key start
LH: loop header
LB: loop body
LE: loop exit
PB: predicated region body
PF: predicated region fallthrough
CT: control target
= control target key end

     0   :  { %s387_s9 = smov 0   ;;  %s389_s10 = smov 0   ;;  %s435_s0 = inlined_call_operand.vmem [shape: f32[16,32], index: 0, kind: input, shape index: {}]   ;;  %s436_s1 = inlined_call_operand.vmem [shape: f32[16,1], index: 1, kind: input, shape index: {}]   ;;  %s437_s2 = inlined_call_operand.vmem [shape: f32[16,1], index: 2, kind: output, shape index: {}]  }
   0x1   :  { %s391_s11 = smov 0  }
   0x2 LB: > { %s24_s12 = sadd.s32 1, %s363_s10  ;;  %p305_p0 = scmp.ge.s32.totalorder %s367_s11, 1  ;;  %s367_s11 = sphi %s391_s11, %s12_s11   ;;  %s363_s10 = sphi %s389_s10, %s439_s10   ;;  %s359_s9 = sphi %s387_s9, %s438_s9  }
   0x3   : > { %p26_p1 = scmp.ge.s32.totalorder %s24_s12, 2  ;;  %p137_p2 = scmp.lt.s32.totalorder %s367_s11, 3 }
   0x5   : > { %s441_s12 = smov (%p26_p1, %s24_s12), 0  ;;  %p138_p3 = pnand %p305_p0, %p137_p2 }
   0x6   : > { %p164_p4 = scmp.lt.s32.totalorder (!%p138_p3), %s359_s9, 1 }
   0x7   : > { %141 = sbr.rel (%p138_p3) target bundleno = 404 (0x194), region = 28 }
   0xc   : > { %vm183_vm0 = vcmask 7168   ;;  %v369_v0 = vmov -1e+30   ;;  %s443_s9 = smov (!%p164_p4, %s359_s9), 1  ;;  %vm188_vm1 = vcmask 261120   ;;  %v370_v3 = vmov 0  }
   0xd   : > { %184 = vst.msk [vmem:[#allocation2] sm:$0xff] %vm183_vm0, %v369_v0  ;;  %s406_s13 = sshll.u32 %s443_s9, 3  ;;  %338 = vset.pattern.permute.xlu0 %v370_v3  ;;  %v371_v4 = vmov 0.0  }
   0xe   : > { %s170_s16 = scalar_lea.vmem %s435_s0, %s406_s13  ;;  %185 = vst.msk [vmem:[#allocation3] sm:$0xff] %vm183_vm0, %v371_v4  ;;  %s174_s19 = scalar_lea.vmem %s436_s1, %s406_s13 }
   0xf   : > { %v186_v1 = vld [vmem:[%s170_s16] sm:$0xff]  ;;  %s178_s22 = scalar_lea.vmem %s437_s2, %s406_s13 }
  0x10   : > { %v189_v2 = vsel %vm188_vm1, %v186_v1, -inf  ;;  %v221_v23 = vld [vmem:[%s174_s19] sm:$0xff] }
  0x11   : > { %190 = vmax.xlane.f32.xlu0 %v189_v2 }
  0x14   : > { %v187_v5 = vld [vmem:[#allocation2] sm:$0xff] }
  0x15   : > { %v196_v16 = vld [vmem:[#allocation3] sm:$0xff] }
  0x84   : > { %v191_v6 = vpop.xlane.xlu0 %190 }
  0x85   : > { %v192_v7 = vmax.f32 %v187_v5, %v191_v6 }
  0x87   : > { %v193_v8 = vsub.f32 %v187_v5, %v192_v7  ;;  %212 = vst.msk [vmem:[#allocation2] sm:$0xff] %vm183_vm0, %v192_v7  ;;  %200 = vperm.xlu0 %338, %v192_v7  }
  0x89   : > { %v194_v14 = vmul.f32 1.442695, %v193_v8 }
  0x8e   : > { %v216_v24 = vld [vmem:[#allocation2] sm:$0xff] }
  0xf9   : > { %v201_v9 = vpop.permute.xlu0 %200 }
  0xfa   : > { %v203_v10 = vsub.f32 %v186_v1, %v201_v9 }
  0xfc   : > { %v204_v11 = vmul.f32 1.442695, %v203_v10 }
  0xfe   : > { %339 = vpow2.f32 %v204_v11 }
  0xff   : > { %341 = vpow2.f32 %v194_v14 }
 0x104   : > { %v340_v12 = vpop.eup %339 }
 0x105   : > { %v206_v13 = vsel %vm188_vm1, %v340_v12, 0.0  ;;  %v342_v15 = vpop.eup %341 }
 0x106   : > { %207 = vadd.xlane.f32.xlu1 %v206_v13  ;;  %v197_v17 = vmul.f32 %v342_v15, %v196_v16 }
 0x179   : > { %v208_v18 = vpop.xlane.xlu1 %207 }
 0x17a   : > { %v209_v19 = vadd.f32 %v208_v18, %v197_v17 }
 0x17c   : > { %211 = vst.msk [vmem:[#allocation3] sm:$0xff] %vm183_vm0, %v209_v19 }
 0x183   : > { %v217_v20 = vld [vmem:[#allocation3] sm:$0xff] }
 0x184   : > { %343 = vlog2.f32 %v217_v20 }
 0x18a   : > { %v344_v21 = vpop.eup %343 }
 0x18b   : > { %v219_v22 = vmul.f32 0.6931472, %v344_v21 }
 0x18d   : > { %v220_v25 = vadd.f32 %v219_v22, %v216_v24 }
 0x18f   : > { %v222_v26 = vsub.f32 %v220_v25, %v221_v23 }
 0x191   : > { %v223_v27 = vmin.f32 %v222_v26, 73.682724 }
 0x193   : > { %224 = vst.msk [vmem:[%s178_s22] sm:$0xff] %vm183_vm0, %v223_v27 }
 0x194 PF: > { %s12_s11 = sadd.s32 1, %s367_s11   ;;  %s438_s9 = smov %s363_s10 }
 0x195   : > { %p9_p5 = scmp.ge.s32.totalorder %s12_s11, 4   ;;  %s439_s10 = smov %s441_s12 }
 0x197   :  { %11 = sbr.rel (!%p9_p5) target bundleno = 2 (0x2), region = 69 }

</bundles_post_ra>
